<compile_context>
chip_gen: v7x
topology: tpu7x:2x2x1
jax: 0.10.0
libtpu: 0.0.40
codegen_flags: <defaults>
</compile_context>

<pallas_src>
import jax
import jax.numpy as jnp
from jax.experimental import pallas as pl
from jax.experimental.pallas import tpu as pltpu

_LANE = 128      # feature-dim padding multiple (lane width)
_SUBLANE = 8     # batch-dim padding multiple
_DEFAULT_TILE_M = 256   # batch tile: fits v7x ranges (128-256) and v5e/v6e (256-512)


def _round_up(n, m):
    return (n + m - 1) // m * m


def _pad2d(a, rows, cols):
    r, c = a.shape
    return jnp.pad(a, ((0, rows - r), (0, cols - c)))


def _vmem_limit_bytes(tm, Finp, Hp, Foutp):
    """Actual per-step block footprint (x buffer counts) + margin, capped at
    ~80% of the physical per-core VMEM (generation-aware; v7x only has 64 MiB)."""
    need = 0
    need += 2 * tm * Finp * 2            # x   blocks (bf16, double-buffered)
    need += 2 * tm * Hp * 2              # y   blocks (bf16, double-buffered)
    need += 2 * tm * Hp * 4              # enc blocks (f32,  double-buffered)
    need += 2 * tm * Foutp * 4           # dec blocks (f32,  double-buffered)
    need += 2 * (Finp * Hp + Hp * Foutp) * 2   # weights (bf16), budget 2 buffers
    need += 2 * _SUBLANE * (Hp + Foutp) * 4    # biases (f32), sublane-padded
    try:
        cap = int(pltpu.get_tpu_info().vmem_capacity_bytes * 0.8)
    except Exception:
        cap = 48 << 20   # conservative fallback that is safe on v7x's 64 MiB
    return int(min(max(need * 3 // 2 + (2 << 20), 8 << 20), cap))


def _autoencoder_kernel(x_ref, we_ref, be_ref, y_ref, wd_ref, bd_ref,
                        enc_ref, dec_ref):
    """Fused forward for one batch tile:
       enc = relu(x @ We + be), dec = sigmoid(y @ Wd + bd)."""
    # Encoder: MXU matmul (bf16 in, f32 accumulate) + VPU bias/relu epilogue.
    enc = jnp.dot(x_ref[...], we_ref[...], preferred_element_type=jnp.float32)
    enc = jnp.maximum(enc + be_ref[...], 0.0)
    enc_ref[...] = enc.astype(enc_ref.dtype)

    # Decoder: MXU matmul + EUP sigmoid epilogue (keeps the divide off the VALU).
    dec = jnp.dot(y_ref[...], wd_ref[...], preferred_element_type=jnp.float32)
    dec = jax.nn.sigmoid(dec + bd_ref[...])
    dec_ref[...] = dec.astype(dec_ref.dtype)


def prepare_params(params):
    """One-time padding + bf16 cast of the weights (hoisted out of the hot path)."""
    Fin, H = params["enc_w"].shape
    H2, Fout = params["dec_w"].shape
    assert H == H2
    Finp = _round_up(Fin, _LANE)
    Hp = _round_up(H, _LANE)
    Foutp = _round_up(Fout, _LANE)
    return {
        "enc_w": _pad2d(params["enc_w"], Finp, Hp).astype(jnp.bfloat16),
        "enc_b": _pad2d(params["enc_b"].reshape(1, -1), 1, Hp).astype(jnp.float32),
        "dec_w": _pad2d(params["dec_w"], Hp, Foutp).astype(jnp.bfloat16),
        "dec_b": _pad2d(params["dec_b"].reshape(1, -1), 1, Foutp).astype(jnp.float32),
        "dims": (Fin, H, Fout),
    }


def autoencoder_forward(x, y, prepared, *, tile_m=_DEFAULT_TILE_M):
    """Mirrors Autoencoder.forward: returns (encoded, decoded)."""
    Fin, H, Fout = prepared["dims"]
    B, xf = x.shape
    By, yf = y.shape
    assert xf == Fin and yf == H

    Finp, Hp = prepared["enc_w"].shape
    _, Foutp = prepared["dec_w"].shape

    # Batch tiling: tm is a multiple of 8 (or the whole padded batch when small);
    # Bp is a multiple of tm so every grid step sees a full, lane/sublane-dense tile.
    Bmax = max(B, By)
    tm = min(tile_m, _round_up(Bmax, _SUBLANE))
    Bp = _round_up(Bmax, tm)

    xp = _pad2d(x, Bp, Finp).astype(jnp.bfloat16)
    yp = _pad2d(y, Bp, Hp).astype(jnp.bfloat16)

    enc_p, dec_p = pl.pallas_call(
        _autoencoder_kernel,
        out_shape=(
            jax.ShapeDtypeStruct((Bp, Hp), jnp.float32),
            jax.ShapeDtypeStruct((Bp, Foutp), jnp.float32),
        ),
        grid_spec=pltpu.PrefetchScalarGridSpec(
            num_scalar_prefetch=0,
            grid=(Bp // tm,),
            in_specs=[
                pl.BlockSpec((tm, Finp), lambda i: (i, 0)),    # x tile
                pl.BlockSpec((Finp, Hp), lambda i: (0, 0)),    # enc W (resident)
                pl.BlockSpec((1, Hp), lambda i: (0, 0)),       # enc b (resident)
                pl.BlockSpec((tm, Hp), lambda i: (i, 0)),      # y tile
                pl.BlockSpec((Hp, Foutp), lambda i: (0, 0)),   # dec W (resident)
                pl.BlockSpec((1, Foutp), lambda i: (0, 0)),    # dec b (resident)
            ],
            out_specs=[
                pl.BlockSpec((tm, Hp), lambda i: (i, 0)),      # encoded tile
                pl.BlockSpec((tm, Foutp), lambda i: (i, 0)),   # decoded tile
            ],
        ),
        compiler_params=pltpu.CompilerParams(
            dimension_semantics=("parallel",),
            vmem_limit_bytes=_vmem_limit_bytes(tm, Finp, Hp, Foutp),
        ),
    )(xp, prepared["enc_w"], prepared["enc_b"],
      yp, prepared["dec_w"], prepared["dec_b"])

    return enc_p[:B, :H], dec_p[:By, :Fout]


def init_params(key, input_size, input_size2, hidden_size):
    k1, k2, k3, k4 = jax.random.split(key, 4)
    enc_bound = 1.0 / jnp.sqrt(input_size)
    dec_bound = 1.0 / jnp.sqrt(hidden_size)
    return {
        "enc_w": jax.random.uniform(
            k1, (input_size, hidden_size), jnp.float32, -enc_bound, enc_bound),
        "enc_b": jax.random.uniform(
            k2, (hidden_size,), jnp.float32, -enc_bound, enc_bound),
        "dec_w": jax.random.uniform(
            k3, (hidden_size, input_size2), jnp.float32, -dec_bound, dec_bound),
        "dec_b": jax.random.uniform(
            k4, (input_size2,), jnp.float32, -dec_bound, dec_bound),
    }


def _reference(x, y, params):
    # Reference uses the same bf16-rounded inputs/weights the kernel consumes,
    # with f32 accumulation (so it matches the MXU path tightly).
    xb = x.astype(jnp.bfloat16).astype(jnp.float32)
    yb = y.astype(jnp.bfloat16).astype(jnp.float32)
    we = params["enc_w"].astype(jnp.bfloat16).astype(jnp.float32)
    wd = params["dec_w"].astype(jnp.bfloat16).astype(jnp.float32)
    enc = jnp.maximum(xb @ we + params["enc_b"], 0.0)
    dec = jax.nn.sigmoid(yb @ wd + params["dec_b"])
    return enc, dec


if __name__ == "__main__":
    # Small shapes consistent with the module's forward:
    #   x: [batch, input_size]   feeds the encoder
    #   y: [batch, hidden_size]  feeds the decoder (forward applies decoder to y)
    batch, input_size, input_size2, hidden_size = 8, 64, 64, 32

    key = jax.random.PRNGKey(0)
    kx, ky, kp, kx2, ky2 = jax.random.split(key, 5)
    params = init_params(kp, input_size, input_size2, hidden_size)
    prepared = prepare_params(params)   # pad + bf16-cast weights once

    # --- small-shape check (single grid step) ---
    x = jax.random.normal(kx, (batch, input_size), jnp.float32)
    y = jax.random.normal(ky, (batch, hidden_size), jnp.float32)
    encoded, decoded = autoencoder_forward(x, y, prepared)
    jax.block_until_ready((encoded, decoded))

    enc_ref, dec_ref = _reference(x, y, params)
    assert encoded.shape == enc_ref.shape and decoded.shape == dec_ref.shape
    assert jnp.allclose(encoded, enc_ref, atol=2e-3, rtol=2e-3)
    assert jnp.allclose(decoded, dec_ref, atol=2e-3, rtol=2e-3)

    # --- multi-tile check (exercises batch tiling / padded last tile) ---
    batch2 = 272   # tm=256 -> Bp=512, grid=(2,), last tile partially padded
    x2 = jax.random.normal(kx2, (batch2, input_size), jnp.float32)
    y2 = jax.random.normal(ky2, (batch2, hidden_size), jnp.float32)
    encoded2, decoded2 = autoencoder_forward(x2, y2, prepared)
    jax.block_until_ready((encoded2, decoded2))

    enc_ref2, dec_ref2 = _reference(x2, y2, params)
    assert encoded2.shape == enc_ref2.shape and decoded2.shape == dec_ref2.shape
    assert jnp.allclose(encoded2, enc_ref2, atol=2e-3, rtol=2e-3)
    assert jnp.allclose(decoded2, dec_ref2, atol=2e-3, rtol=2e-3)

    print("KERNEL_OK")
</pallas_src>

<mosaic_0001>
module attributes {stable_mosaic.version = 11 : i64} {
  func.func @_autoencoder_kernel(%arg0: i32, %arg1: memref<8x128xbf16, #tpu.memory_space<vmem>>, %arg2: memref<128x128xbf16, #tpu.memory_space<vmem>>, %arg3: memref<1x128xf32, #tpu.memory_space<vmem>>, %arg4: memref<8x128xbf16, #tpu.memory_space<vmem>>, %arg5: memref<128x128xbf16, #tpu.memory_space<vmem>>, %arg6: memref<1x128xf32, #tpu.memory_space<vmem>>, %arg7: memref<8x128xf32, #tpu.memory_space<vmem>>, %arg8: memref<8x128xf32, #tpu.memory_space<vmem>>) attributes {dimension_semantics = [#tpu.dimension_semantics<parallel>], iteration_bounds = array<i64: 1>, scalar_prefetch = 0 : i64, scratch_operands = 0 : i64, tpu.core_type = #tpu.core_type<tc>, window_params = [{transform_indices = @transform_0, window_bounds = array<i64: 8, 128>}, {pipeline_mode = #tpu.pipeline_mode<synchronous>, transform_indices = @transform_1, window_bounds = array<i64: 128, 128>}, {pipeline_mode = #tpu.pipeline_mode<synchronous>, transform_indices = @transform_2, window_bounds = array<i64: 1, 128>}, {transform_indices = @transform_3, window_bounds = array<i64: 8, 128>}, {pipeline_mode = #tpu.pipeline_mode<synchronous>, transform_indices = @transform_4, window_bounds = array<i64: 128, 128>}, {pipeline_mode = #tpu.pipeline_mode<synchronous>, transform_indices = @transform_5, window_bounds = array<i64: 1, 128>}, {transform_indices = @transform_6, window_bounds = array<i64: 8, 128>}, {transform_indices = @transform_7, window_bounds = array<i64: 8, 128>}]} {
    %c0 = arith.constant 0 : index
    %c0_0 = arith.constant 0 : index
    %0 = vector.load %arg1[%c0, %c0_0] : memref<8x128xbf16, #tpu.memory_space<vmem>>, vector<8x128xbf16>
    %c0_1 = arith.constant 0 : index
    %c0_2 = arith.constant 0 : index
    %1 = vector.load %arg2[%c0_1, %c0_2] : memref<128x128xbf16, #tpu.memory_space<vmem>>, vector<128x128xbf16>
    %cst = arith.constant dense<0.000000e+00> : vector<8x128xf32>
    %2 = tpu.matmul %0, %1, %cst {dimension_numbers = #tpu.dot_dimension_numbers<[1], [0], [0], [1], [0, 0, 1, 1], [], []>} : vector<8x128xbf16>, vector<128x128xbf16>, vector<8x128xf32> -> vector<8x128xf32>
    %c0_3 = arith.constant 0 : index
    %c0_4 = arith.constant 0 : index
    %3 = vector.load %arg3[%c0_3, %c0_4] : memref<1x128xf32, #tpu.memory_space<vmem>>, vector<1x128xf32>
    %4 = vector.broadcast %3 : vector<1x128xf32> to vector<8x128xf32>
    %5 = arith.addf %2, %4 : vector<8x128xf32>
    %cst_5 = arith.constant 0.000000e+00 : f32
    %6 = vector.broadcast %cst_5 : f32 to vector<8x128xf32>
    %7 = arith.maximumf %5, %6 : vector<8x128xf32>
    %c0_6 = arith.constant 0 : index
    %c0_7 = arith.constant 0 : index
    %8 = vector.load %arg7[%c0_6, %c0_7] : memref<8x128xf32, #tpu.memory_space<vmem>>, vector<8x128xf32>
    tpu.vector_store %arg7[%c0_6, %c0_7], %7 {strides = array<i32>} : memref<8x128xf32, #tpu.memory_space<vmem>>, vector<8x128xf32>,
    %c0_8 = arith.constant 0 : index
    %c0_9 = arith.constant 0 : index
    %9 = vector.load %arg4[%c0_8, %c0_9] : memref<8x128xbf16, #tpu.memory_space<vmem>>, vector<8x128xbf16>
    %c0_10 = arith.constant 0 : index
    %c0_11 = arith.constant 0 : index
    %10 = vector.load %arg5[%c0_10, %c0_11] : memref<128x128xbf16, #tpu.memory_space<vmem>>, vector<128x128xbf16>
    %cst_12 = arith.constant dense<0.000000e+00> : vector<8x128xf32>
    %11 = tpu.matmul %9, %10, %cst_12 {dimension_numbers = #tpu.dot_dimension_numbers<[1], [0], [0], [1], [0, 0, 1, 1], [], []>} : vector<8x128xbf16>, vector<128x128xbf16>, vector<8x128xf32> -> vector<8x128xf32>
    %c0_13 = arith.constant 0 : index
    %c0_14 = arith.constant 0 : index
    %12 = vector.load %arg6[%c0_13, %c0_14] : memref<1x128xf32, #tpu.memory_space<vmem>>, vector<1x128xf32>
    %13 = vector.broadcast %12 : vector<1x128xf32> to vector<8x128xf32>
    %14 = arith.addf %11, %13 : vector<8x128xf32>
    %15 = arith.negf %14 : vector<8x128xf32>
    %16 = math.exp %15 : vector<8x128xf32>
    %cst_15 = arith.constant 1.000000e+00 : f32
    %17 = vector.broadcast %cst_15 : f32 to vector<8x128xf32>
    %18 = arith.addf %17, %16 : vector<8x128xf32>
    %19 = arith.divf %17, %18 : vector<8x128xf32>
    %c0_16 = arith.constant 0 : index
    %c0_17 = arith.constant 0 : index
    %20 = vector.load %arg8[%c0_16, %c0_17] : memref<8x128xf32, #tpu.memory_space<vmem>>, vector<8x128xf32>
    tpu.vector_store %arg8[%c0_16, %c0_17], %19 {strides = array<i32>} : memref<8x128xf32, #tpu.memory_space<vmem>>, vector<8x128xf32>,
    return
  }
  func.func @transform_0(%arg0: i32) -> (i32, i32) {
    %c0_i32 = arith.constant 0 : i32
    %c0_i32_0 = arith.constant 0 : i32
    return %arg0, %c0_i32 : i32, i32
  }
  func.func @transform_1(%arg0: i32) -> (i32, i32) {
    %c0_i32 = arith.constant 0 : i32
    %c0_i32_0 = arith.constant 0 : i32
    %c0_i32_1 = arith.constant 0 : i32
    return %c0_i32, %c0_i32_0 : i32, i32
  }
  func.func @transform_2(%arg0: i32) -> (i32, i32) {
    %c0_i32 = arith.constant 0 : i32
    %c0_i32_0 = arith.constant 0 : i32
    %c0_i32_1 = arith.constant 0 : i32
    return %c0_i32, %c0_i32_0 : i32, i32
  }
  func.func @transform_3(%arg0: i32) -> (i32, i32) {
    %c0_i32 = arith.constant 0 : i32
    %c0_i32_0 = arith.constant 0 : i32
    return %arg0, %c0_i32 : i32, i32
  }
  func.func @transform_4(%arg0: i32) -> (i32, i32) {
    %c0_i32 = arith.constant 0 : i32
    %c0_i32_0 = arith.constant 0 : i32
    %c0_i32_1 = arith.constant 0 : i32
    return %c0_i32, %c0_i32_0 : i32, i32
  }
  func.func @transform_5(%arg0: i32) -> (i32, i32) {
    %c0_i32 = arith.constant 0 : i32
    %c0_i32_0 = arith.constant 0 : i32
    %c0_i32_1 = arith.constant 0 : i32
    return %c0_i32, %c0_i32_0 : i32, i32
  }
  func.func @transform_6(%arg0: i32) -> (i32, i32) {
    %c0_i32 = arith.constant 0 : i32
    %c0_i32_0 = arith.constant 0 : i32
    return %arg0, %c0_i32 : i32, i32
  }
  func.func @transform_7(%arg0: i32) -> (i32, i32) {
    %c0_i32 = arith.constant 0 : i32
    %c0_i32_0 = arith.constant 0 : i32
    return %arg0, %c0_i32 : i32, i32
  }
}

</mosaic_0001>

<bundles_post_ra>
// kernel: tpu_custom_call.1
= control target key start
LH: loop header
LB: loop body
LE: loop exit
PB: predicated region body
PF: predicated region fallthrough
CT: control target
= control target key end

     0   :  { %13 = vsyncpa [#allocation3], 0  ;;  %s678_s0 = inlined_call_operand.hbm [shape: bf16[8,128], index: 0, kind: input, shape index: {}]   ;;  %s679_s1 = inlined_call_operand.hbm [shape: bf16[128,128], index: 1, kind: input, shape index: {}]   ;;  %s680_s2 = inlined_call_operand.vmem [shape: f32[1,128], index: 2, kind: input, shape index: {}]   ;;  %s681_s3 = inlined_call_operand.vmem [shape: bf16[8,128], index: 3, kind: input, shape index: {}]   ;;  %s682_s4 = inlined_call_operand.hbm [shape: bf16[128,128], index: 4, kind: input, shape index: {}]   ;;  %s683_s5 = inlined_call_operand.vmem [shape: f32[1,128], index: 5, kind: input, shape index: {}]   ;;  %s684_s6 = inlined_call_operand.hbm [shape: f32[8,128], index: 6, kind: output, shape index: {0}]   ;;  %s685_s7 = inlined_call_operand.hbm [shape: f32[8,128], index: 7, kind: output, shape index: {1}]  }
   0x1   :  { %14 = vsyncpa [#allocation6], 0 }
   0x2   :  { %15 = vsyncpa [#allocation4], 0 }
   0x3   :  { %16 = vsyncpa [#allocation10], 0  ;;  %s554_s24 = smov [#allocation5]   ;;  %s436_s28 = scalar_lea.hbm %s679_s1, 1024 }
   0x4   :  { %s32_s25 = sshll.u32 %s554_s24, 4  ;;  %p437_p0 = scmp.ne.s32.totalorder %s679_s1, %s436_s28  ;;  %s33_s25 = int_to_ptr.vmem [resolvable:$true] %s32_s25 }
   0x5   :  { %p440_p1 = scmp.lt.u32.totalorder %s436_s28, %s679_s1 }
   0x7   :  { %p442_p2 = pnand %p440_p1, %p437_p0 }
   0x9   :  { %445 = shalt.err (!%p442_p2)
}
   0xa   :  { %s446_s10 = scalar_lea.vmem %s33_s25, 1024  ;;  %p451_p4 = scmp.lt.s32.totalorder %s33_s25, %s33_s25 }
   0xb   :  { %p447_p3 = scmp.ne.s32.totalorder %s33_s25, %s446_s10  ;;  %p452_p5 = scmp.lt.s32.totalorder %s446_s10, %s446_s10 }
   0xd   :  { %p453_p6 = por %p452_p5, %p451_p4 }
   0xf   :  { %p454_p7 = pnand %p453_p6, %p447_p3 }
  0x11   :  { %457 = shalt.err (!%p454_p7)
}
  0x12   :  { %s555_s11 = smov 64   ;;  %s556_s12 = smov 4  }
  0x13   :  { %38 = dma.hbm_to_vmem [thread:$0]  %s679_s1, 1024, %s33_s25, [#allocation6], %s555_s11, %s555_s11, %s556_s12  }
  0x14   :  { %s557_s15 = smov [#allocation2]   ;;  %s558_s17 = smov [#allocation7]  }
  0x15   :  { %s23_s16 = sshll.u32 %s557_s15, 4  ;;  %s48_s18 = sshll.u32 %s558_s17, 4  ;;  %s24_s16 = int_to_ptr.vmem [resolvable:$true] %s23_s16  ;;  %s49_s18 = int_to_ptr.vmem [resolvable:$true] %s48_s18 }
  0x16   :  { %s458_s21 = scalar_lea.hbm %s678_s0, 64 }
  0x17   :  { %p459_p8 = scmp.ne.s32.totalorder %s678_s0, %s458_s21  ;;  %p462_p9 = scmp.lt.u32.totalorder %s458_s21, %s678_s0 }
  0x19   :  { %p464_p10 = pnand %p462_p9, %p459_p8 }
  0x1b   :  { %467 = shalt.err (!%p464_p10)
}
  0x1c   :  { %s468_s1 = scalar_lea.vmem %s24_s16, 64  ;;  %p473_p12 = scmp.lt.s32.totalorder %s24_s16, %s24_s16 }
  0x1d   :  { %p469_p11 = scmp.ne.s32.totalorder %s24_s16, %s468_s1  ;;  %p474_p13 = scmp.lt.s32.totalorder %s468_s1, %s468_s1 }
  0x1f   :  { %p475_p0 = por %p474_p13, %p473_p12 }
  0x21   :  { %p476_p1 = pnand %p475_p0, %p469_p11 }
  0x23   :  { %479 = shalt.err (!%p476_p1)
}
  0x24   :  { %26 = dma.hbm_to_vmem [thread:$0]  %s678_s0, 64, %s24_s16, [#allocation3]  }
  0x25   :  { %s480_s30 = scalar_lea.hbm %s682_s4, 1024 }
  0x26   :  { %p481_p2 = scmp.ne.s32.totalorder %s682_s4, %s480_s30  ;;  %p484_p3 = scmp.lt.u32.totalorder %s480_s30, %s682_s4 }
  0x28   :  { %p486_p4 = pnand %p484_p3, %p481_p2 }
  0x2a   :  { %489 = shalt.err (!%p486_p4)
}
  0x2b   :  { %s490_s14 = scalar_lea.vmem %s49_s18, 1024  ;;  %p495_p6 = scmp.lt.s32.totalorder %s49_s18, %s49_s18 }
  0x2c   :  { %p491_p5 = scmp.ne.s32.totalorder %s49_s18, %s490_s14  ;;  %p496_p7 = scmp.lt.s32.totalorder %s490_s14, %s490_s14 }
  0x2e   :  { %p497_p8 = por %p496_p7, %p495_p6 }
  0x30   :  { %p498_p9 = pnand %p497_p8, %p491_p5 }
  0x32   :  { %501 = shalt.err (!%p498_p9)
}
  0x33   :  { %54 = dma.hbm_to_vmem [thread:$0]  %s682_s4, 1024, %s49_s18, [#allocation6], %s555_s11, %s555_s11, %s556_s12  }
  0x34   :  { %546 = dma.done.wait [#allocation3], 64  }
  0x35   :  { %547 = vsyncadd [#allocation3], 4294967232 }
  0x36   :  { %548 = dma.done.wait [#allocation6], 2048  }
  0x37   :  { %549 = vsyncadd [#allocation6], 4294965248  ;;  %v559_v0 = vmov 0.0   ;;  %vm560_vm0 = vmmov 0   ;;  %v416_v1 = vld [vmem:[#allocation7] sm:$0xff]   ;;  %v417_v2 = vld [vmem:[#allocation7 + $0x8] sm:$0xff]  }
  0x38   :  { %387 = vmatprep.subr.bf16.mxu1 %v559_v0  ;;  %367 = vmatprep.subr.bf16.mxu0 %v559_v0  ;;  %v418_v3 = vld [vmem:[#allocation7 + $0x10] sm:$0xff]   ;;  %v422_v4 = vld [vmem:[#allocation5] sm:$0xff]   ;;  %v424_v5 = vld [vmem:[#allocation5 + $0x8] sm:$0xff]  }
  0x39   :  { %403 = vmatprep.mubr.msk.bf16.mxu1 %vm560_vm0, %v559_v0  ;;  %383 = vmatprep.mubr.msk.bf16.mxu0 %vm560_vm0, %v559_v0  ;;  %v419_v6 = vld [vmem:[#allocation7 + $0x18] sm:$0xff]   ;;  %v426_v7 = vld [vmem:[#allocation5 + $0x10] sm:$0xff]   ;;  %v420_v8 = vld [vmem:[#allocation7 + $0x20] sm:$0xff]  }
  0x3a   :  { %388 = vmatpush3.bf16.msra.mxu1 %v416_v1  ;;  %368 = vmatpush3.bf16.msra.mxu0 %v422_v4  ;;  %v427_v9 = vld [vmem:[#allocation5 + $0x18] sm:$0xff]   ;;  %v421_v10 = vld [vmem:[#allocation7 + $0x28] sm:$0xff]   ;;  %v428_v11 = vld [vmem:[#allocation5 + $0x20] sm:$0xff]  }
  0x3b   :  { %389 = vmatprep.subr.bf16.mxu1 %v559_v0  ;;  %369 = vmatprep.subr.bf16.mxu0 %v559_v0  ;;  %v423_v12 = vld [vmem:[#allocation7 + $0x30] sm:$0xff]   ;;  %v429_v13 = vld [vmem:[#allocation5 + $0x28] sm:$0xff]   ;;  %v425_v14 = vld [vmem:[#allocation7 + $0x38] sm:$0xff]  }
  0x3c   :  { %v430_v15 = vld [vmem:[#allocation5 + $0x30] sm:$0xff]   ;;  %v181_v16 = vld [vmem:[%s681_s3] sm:$0xf]  ;;  %s561_s3 = smov [#allocation8]  }
  0x3d   :  { %v431_v17 = vld [vmem:[#allocation5 + $0x38] sm:$0xff]   ;;  %s306_s19 = sshll.u32 %s561_s3, 4  ;;  %s307_s19 = int_to_ptr.vmem [resolvable:$true] %s306_s19 }
  0x3e   :  { %390 = vmatpush3.bf16.msra.mxu1 %v417_v2  ;;  %370 = vmatpush3.bf16.msra.mxu0 %v424_v5  ;;  %v67_v18 = vld [vmem:[#allocation2] sm:$0xf]  ;;  %p507_p11 = scmp.lt.s32.totalorder %s307_s19, %s307_s19 }
  0x3f   :  { %391 = vmatprep.subr.bf16.mxu1 %v559_v0  ;;  %371 = vmatprep.subr.bf16.mxu0 %v559_v0  ;;  %v339_v19 = vld [vmem:[%s683_s5] ss:$0 sm:$0xff]  ;;  %s502_s5 = scalar_lea.vmem %s307_s19, 128 }
  0x40   :  { %v330_v26 = vld [vmem:[%s680_s2] ss:$0 sm:$0xff]  ;;  %p503_p10 = scmp.ne.s32.totalorder %s307_s19, %s502_s5  ;;  %p508_p12 = scmp.lt.s32.totalorder %s502_s5, %s502_s5 }
  0x42   :  { %392 = vmatpush3.bf16.msra.mxu1 %v418_v3  ;;  %372 = vmatpush3.bf16.msra.mxu0 %v426_v7  ;;  %p509_p13 = por %p508_p12, %p507_p11 }
  0x43   :  { %393 = vmatprep.subr.bf16.mxu1 %v559_v0  ;;  %373 = vmatprep.subr.bf16.mxu0 %v559_v0 }
  0x44   :  { %p510_p0 = pnand %p509_p13, %p503_p10 }
  0x46   :  { %394 = vmatpush3.bf16.msra.mxu1 %v419_v6  ;;  %374 = vmatpush3.bf16.msra.mxu0 %v427_v9 }
  0x47   :  { %395 = vmatprep.subr.bf16.mxu1 %v559_v0  ;;  %375 = vmatprep.subr.bf16.mxu0 %v559_v0 }
  0x4a   :  { %396 = vmatpush3.bf16.msra.mxu1 %v420_v8  ;;  %376 = vmatpush3.bf16.msra.mxu0 %v428_v11 }
  0x4b   :  { %397 = vmatprep.subr.bf16.mxu1 %v559_v0  ;;  %377 = vmatprep.subr.bf16.mxu0 %v559_v0 }
  0x4e   :  { %398 = vmatpush3.bf16.msra.mxu1 %v421_v10  ;;  %378 = vmatpush3.bf16.msra.mxu0 %v429_v13 }
  0x4f   :  { %399 = vmatprep.subr.bf16.mxu1 %v559_v0  ;;  %379 = vmatprep.subr.bf16.mxu0 %v559_v0 }
  0x52   :  { %400 = vmatpush3.bf16.msra.mxu1 %v423_v12  ;;  %380 = vmatpush3.bf16.msra.mxu0 %v430_v15 }
  0x53   :  { %401 = vmatprep.subr.bf16.mxu1 %v559_v0  ;;  %381 = vmatprep.subr.bf16.mxu0 %v559_v0 }
  0x56   :  { %402 = vmatpush3.bf16.msra.mxu1 %v425_v14  ;;  %382 = vmatpush3.bf16.msra.mxu0 %v431_v17 }
  0x59   :  { %404 = vmatmul.mubr.bf16.vlgmr.msra.gmra.mrb[0].mxu1 %v181_v16  ;;  %384 = vmatmul.mubr.bf16.vlgmr.msra.gmra.mrb[0].mxu0 %v67_v18 }
 0x12c   :  { %v287_v20 = vpop.f32.mrb[0].mxu1  ;;  %v173_v27 = vpop.f32.mrb[0].mxu0 }
 0x12d   :  { %v288_v21 = vadd.f32 %v339_v19, %v287_v20  ;;  %v405_v22 = vpop.f32.mrb[1].mxu1  ;;  %v174_v28 = vadd.f32 %v330_v26, %v173_v27  ;;  %v385_v29 = vpop.f32.mrb[1].mxu0 }
 0x12e   :  { %v290_v23 = vpop.f32.mrb[2].mxu1  ;;  %v176_v30 = vpop.f32.mrb[2].mxu0 }
 0x12f   :  { %v348_v24 = vmul.f32 -1.442695, %v288_v21  ;;  %v406_v25 = vpop.f32.mrb[3].mxu1  ;;  %v179_v31 = vmax.f32 %v174_v28, 0.0  ;;  %v386_v32 = vpop.f32.mrb[3].mxu0 }
 0x131   :  { %432 = vpow2.f32 %v348_v24  ;;  %180 = vst [vmem:[#allocation8] sm:$0xff] %v179_v31 }
 0x132   :  { %513 = shalt.err (!%p510_p0)
}
 0x133   :  { %s514_s21 = scalar_lea.hbm %s684_s6, 128 }
 0x134   :  { %p515_p1 = scmp.ne.s32.totalorder %s684_s6, %s514_s21  ;;  %p518_p2 = scmp.lt.u32.totalorder %s514_s21, %s684_s6 }
 0x136   :  { %p520_p3 = pnand %p518_p2, %p515_p1 }
 0x138   :  { %523 = shalt.err (!%p520_p3)
}
 0x139   :  { %309 = dma.vmem_to_hbm [thread:$0]  %s307_s19, 128, %s684_s6, [#allocation4]  }
 0x13a   :  { %s562_s27 = smov [#allocation9]  }
 0x13b   :  { %v433_v33 = vpop.eup %432  ;;  %s316_s28 = sshll.u32 %s562_s27, 4  ;;  %s317_s28 = int_to_ptr.vmem [resolvable:$true] %s316_s28 }
 0x13c   :  { %v296_v34 = vadd.f32 1.0, %v433_v33  ;;  %s524_s29 = scalar_lea.vmem %s317_s28, 128  ;;  %p529_p5 = scmp.lt.s32.totalorder %s317_s28, %s317_s28 }
 0x13d   :  { %p525_p4 = scmp.ne.s32.totalorder %s317_s28, %s524_s29  ;;  %p530_p6 = scmp.lt.s32.totalorder %s524_s29, %s524_s29 }
 0x13e   :  { %434 = vrcp.f32 %v296_v34 }
 0x13f   :  { %p531_p7 = por %p530_p6, %p529_p5 }
 0x141   :  { %p532_p8 = pnand %p531_p7, %p525_p4 }
 0x148   :  { %v435_v35 = vpop.eup %434 }
 0x149   :  { %299 = vst [vmem:[#allocation9] sm:$0xff] %v435_v35 }
 0x14a   :  { %535 = shalt.err (!%p532_p8)
}
 0x14b   :  { %s536_s9 = scalar_lea.hbm %s685_s7, 128 }
 0x14c   :  { %p537_p9 = scmp.ne.s32.totalorder %s685_s7, %s536_s9  ;;  %p540_p10 = scmp.lt.u32.totalorder %s536_s9, %s685_s7 }
 0x14e   :  { %p542_p11 = pnand %p540_p10, %p537_p9 }
 0x150   :  { %545 = shalt.err (!%p542_p11)
}
 0x151   :  { %319 = dma.vmem_to_hbm [thread:$0]  %s317_s28, 128, %s685_s7, [#allocation10]  }
 0x152   :  { %550 = dma.done.wait [#allocation4], 128  }
 0x153   :  { %551 = vsyncadd [#allocation4], 4294967168 }
 0x154   :  { %552 = dma.done.wait [#allocation10], 128  }
 0x155   :  { %553 = vsyncadd [#allocation10], 4294967168 }
 0x156   :  { %326 = vsyncpa [#allocation3], 1 }
 0x157   :  { %327 = vsyncpa [#allocation6], 1 }
 0x158   :  { %328 = vsyncpa [#allocation4], 1 }
 0x159   :  { %329 = vsyncpa [#allocation10], 1 }

</bundles_post_ra>
